<compile_context>
chip_gen: v5e
topology: v5e:2x2
jax: 0.10.0
libtpu: 0.0.40
codegen_flags: <defaults>
</compile_context>

<pallas_src>
import jax
import jax.numpy as jnp
from jax.experimental import pallas as pl
from jax.experimental.pallas import tpu as pltpu


def _round_up(n, m):
    return ((n + m - 1) // m) * m


# --------------------- single-block path (small shapes) ---------------------

def _linear_small_kernel(x_ref, wt_ref, b_ref, o_ref):
    # x_ref: (Bp, K), wt_ref: (K, Np)  [pre-transposed], b_ref: (1, Np)
    y = jnp.dot(x_ref[...], wt_ref[...], preferred_element_type=jnp.float32)
    o_ref[...] = (y + b_ref[...]).astype(o_ref.dtype)


def _linear_small(x_p, wt_p, b_p):
    bp, _ = x_p.shape
    np_pad = wt_p.shape[1]
    vmem = pl.BlockSpec(memory_space=pltpu.MemorySpace.VMEM)
    return pl.pallas_call(
        _linear_small_kernel,
        out_shape=jax.ShapeDtypeStruct((bp, np_pad), x_p.dtype),
        in_specs=[vmem, vmem, vmem],
        out_specs=vmem,
    )(x_p, wt_p, b_p)


# --------------------------- tiled MXU path ---------------------------------

def _linear_tiled_kernel(x_ref, wt_ref, b_ref, o_ref, acc_ref):
    k = pl.program_id(2)

    @pl.when(k == 0)
    def _():
        acc_ref[...] = jnp.zeros_like(acc_ref)

    acc_ref[...] += jnp.dot(x_ref[...], wt_ref[...],
                            preferred_element_type=jnp.float32)

    @pl.when(k == pl.num_programs(2) - 1)
    def _():
        o_ref[...] = (acc_ref[...] + b_ref[...]).astype(o_ref.dtype)


def _linear_tiled(x_p, wt_p, b_p, *, tm, tn, tk):
    mp, kp = x_p.shape
    np_pad = wt_p.shape[1]
    grid = (mp // tm, np_pad // tn, kp // tk)
    return pl.pallas_call(
        _linear_tiled_kernel,
        out_shape=jax.ShapeDtypeStruct((mp, np_pad), x_p.dtype),
        grid_spec=pltpu.PrefetchScalarGridSpec(
            num_scalar_prefetch=0,
            grid=grid,
            in_specs=[
                pl.BlockSpec((tm, tk), lambda i, j, k: (i, k)),
                pl.BlockSpec((tk, tn), lambda i, j, k: (k, j)),
                pl.BlockSpec((1, tn), lambda i, j, k: (0, j)),
            ],
            out_specs=pl.BlockSpec((tm, tn), lambda i, j, k: (i, j)),
            scratch_shapes=[pltpu.VMEM((tm, tn), jnp.float32)],
        ),
        compiler_params=pltpu.CompilerParams(
            dimension_semantics=("parallel", "parallel", "arbitrary")),
    )(x_p, wt_p, b_p)


# ------------------------------- wrapper -------------------------------------

def identify_net_forward(x, weight, bias, *, tm=256, tn=256, tk=256,
                         use_tiled=None):
    """y = x @ weight.T + bias  (torch.nn.Linear semantics).

    x:      [batch, input_n]    float32
    weight: [output_n, input_n] float32 (torch layout)
    bias:   [output_n]          float32
    returns [batch, output_n]   float32
    """
    batch, input_n = x.shape
    output_n = weight.shape[0]

    if use_tiled is None:
        bp = _round_up(batch, 8)
        np_pad = _round_up(output_n, 128)
        single_bytes = 4 * (bp * input_n + input_n * np_pad + np_pad
                            + bp * np_pad)
        use_tiled = single_bytes > (4 << 20)   # keep single block well in VMEM

    wt = weight.T  # pre-transpose once in XLA: [input_n, output_n]

    if not use_tiled:
        bp = _round_up(batch, 8)              # sublane-aligned batch
        np_pad = _round_up(output_n, 128)     # lane-dense output stores
        x_p = jnp.pad(x, ((0, bp - batch), (0, 0)))
        wt_p = jnp.pad(wt, ((0, 0), (0, np_pad - output_n)))
        b_p = jnp.pad(bias, (0, np_pad - output_n)).reshape(1, np_pad)
        y_p = _linear_small(x_p, wt_p, b_p)
    else:
        mp = _round_up(batch, tm)
        kp = _round_up(input_n, tk)
        np_pad = _round_up(output_n, tn)
        x_p = jnp.pad(x, ((0, mp - batch), (0, kp - input_n)))
        wt_p = jnp.pad(wt, ((0, kp - input_n), (0, np_pad - output_n)))
        b_p = jnp.pad(bias, (0, np_pad - output_n)).reshape(1, np_pad)
        y_p = _linear_tiled(x_p, wt_p, b_p, tm=tm, tn=tn, tk=tk)

    return y_p[:batch, :output_n]


if __name__ == "__main__":
    key = jax.random.PRNGKey(0)
    k1, k2, k3, k4, k5, k6 = jax.random.split(key, 6)

    # IdentifyNet(input_n=32, output_n=16), batch=8 -> single-block path.
    batch, input_n, output_n = 8, 32, 16
    bound = 1.0 / (input_n ** 0.5)
    x = jax.random.normal(k1, (batch, input_n), dtype=jnp.float32)
    w = jax.random.uniform(k2, (output_n, input_n), jnp.float32, -bound, bound)
    b = jax.random.uniform(k3, (output_n,), jnp.float32, -bound, bound)

    y = identify_net_forward(x, w, b)
    jax.block_until_ready(y)
    y_ref = x @ w.T + b
    assert y.shape == (batch, output_n)
    assert jnp.allclose(y, y_ref, atol=1e-5, rtol=1e-5)

    # Scaled-up shapes exercise the tiled MXU path (grid (1,1,2) here).
    B2, K2, N2 = 256, 512, 256
    bound2 = 1.0 / (K2 ** 0.5)
    x2 = jax.random.normal(k4, (B2, K2), dtype=jnp.float32)
    w2 = jax.random.uniform(k5, (N2, K2), jnp.float32, -bound2, bound2)
    b2 = jax.random.uniform(k6, (N2,), jnp.float32, -bound2, bound2)

    y2 = identify_net_forward(x2, w2, b2, use_tiled=True)
    jax.block_until_ready(y2)
    y2_ref = x2 @ w2.T + b2
    assert y2.shape == (B2, N2)
    assert jnp.allclose(y2, y2_ref, atol=5e-3, rtol=5e-3)

    print("KERNEL_OK")
</pallas_src>

<mosaic_0001>
module attributes {stable_mosaic.version = 11 : i64} {
  func.func @_linear_small_kernel(%arg0: memref<8x32xf32, #tpu.memory_space<vmem>>, %arg1: memref<32x128xf32, #tpu.memory_space<vmem>>, %arg2: memref<1x128xf32, #tpu.memory_space<vmem>>, %arg3: memref<8x128xf32, #tpu.memory_space<vmem>>) attributes {dimension_semantics = [], scalar_prefetch = 0 : i64, scratch_operands = 0 : i64, tpu.core_type = #tpu.core_type<tc>} {
    %c0 = arith.constant 0 : index
    %c0_0 = arith.constant 0 : index
    %0 = vector.load %arg0[%c0, %c0_0] : memref<8x32xf32, #tpu.memory_space<vmem>>, vector<8x32xf32>
    %c0_1 = arith.constant 0 : index
    %c0_2 = arith.constant 0 : index
    %1 = vector.load %arg1[%c0_1, %c0_2] : memref<32x128xf32, #tpu.memory_space<vmem>>, vector<32x128xf32>
    %cst = arith.constant dense<0.000000e+00> : vector<8x128xf32>
    %2 = tpu.matmul %0, %1, %cst {dimension_numbers = #tpu.dot_dimension_numbers<[1], [0], [0], [1], [0, 0, 1, 1], [], []>} : vector<8x32xf32>, vector<32x128xf32>, vector<8x128xf32> -> vector<8x128xf32>
    %c0_3 = arith.constant 0 : index
    %c0_4 = arith.constant 0 : index
    %3 = vector.load %arg2[%c0_3, %c0_4] : memref<1x128xf32, #tpu.memory_space<vmem>>, vector<1x128xf32>
    %4 = vector.broadcast %3 : vector<1x128xf32> to vector<8x128xf32>
    %5 = arith.addf %2, %4 : vector<8x128xf32>
    %c0_5 = arith.constant 0 : index
    %c0_6 = arith.constant 0 : index
    %6 = vector.load %arg3[%c0_5, %c0_6] : memref<8x128xf32, #tpu.memory_space<vmem>>, vector<8x128xf32>
    tpu.vector_store %arg3[%c0_5, %c0_6], %5 {strides = array<i32>} : memref<8x128xf32, #tpu.memory_space<vmem>>, vector<8x128xf32>,
    return
  }
}

</mosaic_0001>

<bundles_post_ra>
// kernel: tpu_custom_call.1
= control target key start
LH: loop header
LB: loop body
LE: loop exit
PB: predicated region body
PF: predicated region fallthrough
CT: control target
= control target key end

     0   :  { %8 = vsyncpa [#allocation3], 0  ;;  %s219_s0 = inlined_call_operand.hbm [shape: f32[8,32], index: 0, kind: input, shape index: {}]   ;;  %s220_s1 = inlined_call_operand.hbm [shape: f32[32,128], index: 1, kind: input, shape index: {}]   ;;  %s221_s2 = inlined_call_operand.vmem [shape: f32[1,128], index: 2, kind: input, shape index: {}]   ;;  %s222_s3 = inlined_call_operand.hbm [shape: f32[8,128], index: 3, kind: output, shape index: {}]  }
   0x1   :  { %9 = vsyncpa [#allocation6], 0 }
   0x2   :  { %10 = vsyncpa [#allocation4], 0  ;;  %s16_s14 = sshll.u32 %s219_s0, 4  ;;  %s182_s15 = smov [#allocation2]   ;;  %s17_s14 = int_to_ptr.hbm [resolvable:$true] %s16_s14 }
   0x3   :  { %s18_s16 = sshll.u32 %s182_s15, 4  ;;  %s26_s19 = sshll.u32 %s220_s1, 4  ;;  %s19_s16 = int_to_ptr.vmem [resolvable:$true] %s18_s16  ;;  %s27_s19 = int_to_ptr.hbm [resolvable:$true] %s26_s19 }
   0x4   :  { %21 = dma.hbm_to_vmem [thread:$0]  %s17_s14, 128, %s19_s16, [#allocation3]  }
   0x5   :  { %s183_s20 = smov [#allocation5]   ;;  %s184_s22 = smov 128  }
   0x6   :  { %s28_s21 = sshll.u32 %s183_s20, 4  ;;  %s185_s23 = smov 8   ;;  %s29_s21 = int_to_ptr.vmem [resolvable:$true] %s28_s21 }
   0x7   :  { %34 = dma.hbm_to_vmem [thread:$0]  %s27_s19, 512, %s29_s21, [#allocation6], %s184_s22, %s184_s22, %s185_s23  }
   0x8   :  { %176 = dma.done.wait [#allocation3], 128  }
   0x9   :  { %177 = vsyncadd [#allocation3], 4294967168 }
   0xa   :  { %178 = dma.done.wait [#allocation6], 512  }
   0xb   :  { %179 = vsyncadd [#allocation6], 4294966784  ;;  %v49_v0 = vld [vmem:[#allocation5 + $0x18] sm:$0xff]  ;;  %v48_v1 = vld [vmem:[#allocation5 + $0x10] sm:$0xff]  ;;  %vm54_vm0 = vcmask 261120   ;;  %s186_s24 = smov [#allocation7]  }
   0xc   :  { %70 = vmatpush.msra.mxu0 %v49_v0  ;;  %v47_v2 = vld [vmem:[#allocation5 + $0x8] sm:$0xff]  ;;  %v46_v3 = vld [vmem:[#allocation5] sm:$0xff]  ;;  %v45_v4 = vld [vmem:[#allocation2] sm:$0xff]  ;;  %s84_s25 = sshll.u32 %s186_s24, 4  ;;  %s86_s28 = sshll.u32 %s222_s3, 4  ;;  %s85_s25 = int_to_ptr.vmem [resolvable:$true] %s84_s25  ;;  %s87_s28 = int_to_ptr.hbm [resolvable:$true] %s86_s28 }
   0xd   :  { %v103_v5 = vld [vmem:[%s221_s2] ss:$0 sm:$0xff] }
   0xe   :  { %71 = vmatpush.msra.mxu0 %v48_v1 }
  0x10   :  { %72 = vmatpush.msra.mxu0 %v47_v2 }
  0x12   :  { %73 = vmatpush.msra.mxu0 %v46_v3 }
  0x13   :  { %97 = vmatmul.msk.f32.vlgmr.msra.gmra.mxu0 %vm54_vm0, %v45_v4 }
  0x90   :  { %v75_v6 = vpop.f32.mrf.mxu0 }
  0x91   :  { %v76_v7 = vadd.f32 %v103_v5, %v75_v6 }
  0x93   :  { %78 = vst [vmem:[#allocation7] sm:$0xff] %v76_v7 }
  0x94   :  { %89 = dma.vmem_to_hbm [thread:$0]  %s85_s25, 128, %s87_s28, [#allocation4]  }
  0x95   :  { %180 = dma.done.wait [#allocation4], 128  }
  0x96   :  { %181 = vsyncadd [#allocation4], 4294967168 }
  0x97   :  { %94 = vsyncpa [#allocation3], 1 }
  0x98   :  { %95 = vsyncpa [#allocation6], 1 }
  0x99   :  { %96 = vsyncpa [#allocation4], 1 }

</bundles_post_ra>
